<compile_context>
chip_gen: v7x
topology: tpu7x:2x2x1
jax: 0.10.0
libtpu: 0.0.40
codegen_flags: <defaults>
</compile_context>

<pallas_src>
import jax
import jax.numpy as jnp
from jax.experimental import pallas as pl
from jax.experimental.pallas import tpu as pltpu

_LANES = 128
_VMEM_LIMIT_BYTES = 32 * 1024 * 1024   # safe on v5e/v6e (128 MiB) and v7x (64 MiB/TC)
_MAX_BLOCK_BYTES = 6 * 1024 * 1024     # 2 in-bufs + 2 out-bufs stay < 24 MiB


def _h_swish_kernel(x_ref, o_ref):
    # hard-swish: x * relu6(x + 3) / 6 == x * clamp(x + 3, 0, 6) * (1/6)
    xf = x_ref[...].astype(jnp.float32)                  # no-op for f32 input
    gate = jnp.clip(xf + 3.0, 0.0, 6.0) * (1.0 / 6.0)
    o_ref[...] = (xf * gate).astype(o_ref.dtype)


def _h_swish_ref(x):
    """Plain-jnp path for tiny tails / tiny inputs (not worth a kernel launch)."""
    xf = x.astype(jnp.float32)
    return (xf * (jnp.clip(xf + 3.0, 0.0, 6.0) * (1.0 / 6.0))).astype(x.dtype)


def _sublane_multiple(dtype) -> int:
    # Minimum sublane multiple for a legal TPU tile, by element width.
    itemsize = jnp.dtype(dtype).itemsize
    return {4: 8, 2: 16, 1: 32}.get(itemsize, 8)


def _round_up(n: int, m: int) -> int:
    return ((n + m - 1) // m) * m


def _padded_row_bytes(shape, dtype) -> int:
    """Padded VMEM footprint of a single leading-index slice of `shape`."""
    itemsize = jnp.dtype(dtype).itemsize
    sub = _sublane_multiple(dtype)
    trailing = shape[1:]
    if len(trailing) == 1:
        return _round_up(trailing[0], _LANES) * itemsize
    inner = 1
    for d in trailing[:-2]:
        inner *= d
    return (inner * _round_up(trailing[-2], sub)
            * _round_up(trailing[-1], _LANES) * itemsize)


def _run_rows(arr, *, target_block_bytes, min_grid_blocks, donate):
    """Apply the kernel to `arr`, tiling only the leading (row) axis."""
    R = arr.shape[0]
    trailing = tuple(arr.shape[1:])
    dtype = arr.dtype
    sub = _sublane_multiple(dtype)
    row_bytes = _padded_row_bytes(arr.shape, dtype)

    # Tile sizing: close to target_block_bytes (amortize ~0.35 us/step), but
    # keep >= min_grid_blocks grid steps when possible so the "parallel" axis
    # splits evenly across both TensorCores on v7x.
    mg = max(1, min_grid_blocks)
    tile_r = max(1, target_block_bytes // row_bytes)
    tile_r = min(tile_r, max(1, R // min(mg, R)))
    tile_r = min(tile_r, R)
    if len(trailing) == 1 and tile_r < R:
        # Second-to-last block dim must be a sublane multiple unless it spans
        # the whole array.
        tile_r = min(R, max(sub, (tile_r // sub) * sub))

    nd = 1 + len(trailing)
    block_shape = (tile_r,) + trailing
    index_map = lambda i: (i,) + (0,) * (nd - 1)
    grid = (pl.cdiv(R, tile_r),)          # ragged final block is masked by Pallas

    extra = {"input_output_aliases": {0: 0}} if donate else {}
    return pl.pallas_call(
        _h_swish_kernel,
        out_shape=jax.ShapeDtypeStruct(arr.shape, dtype),
        grid_spec=pltpu.PrefetchScalarGridSpec(
            num_scalar_prefetch=0,
            grid=grid,
            in_specs=[pl.BlockSpec(block_shape, index_map)],
            out_specs=pl.BlockSpec(block_shape, index_map),
        ),
        compiler_params=pltpu.CompilerParams(
            dimension_semantics=("parallel",),
            vmem_limit_bytes=_VMEM_LIMIT_BYTES,
        ),
        cost_estimate=pl.CostEstimate(
            flops=5 * arr.size,
            transcendentals=0,
            bytes_accessed=2 * arr.size * jnp.dtype(dtype).itemsize,
        ),
        **extra,
    )(arr)


def _flat_path(x, **kw):
    """Fallback: lane-major flat tiling (1-D inputs / oversized single slices)."""
    total = x.size
    if total < _LANES:
        return _h_swish_ref(x)            # less than one lane row; skip the launch
    x_flat = x.reshape(-1)
    aligned = (total // _LANES) * _LANES
    head = x_flat[:aligned].reshape(aligned // _LANES, _LANES)
    out_head = _run_rows(head, **kw).reshape(-1)
    if aligned == total:
        return out_head.reshape(x.shape)
    # TODO(synk): the prefix slice + concatenate below each cost an extra HBM
    # pass; only reached for 1-D ragged inputs or > 6 MiB single leading slices.
    tail = _h_swish_ref(x_flat[aligned:])
    return jnp.concatenate([out_head, tail]).reshape(x.shape)


def h_swish(x: jax.Array,
            *,
            target_block_bytes: int = 2 * 1024 * 1024,
            min_grid_blocks: int = 8,
            donate: bool = False) -> jax.Array:
    """Elementwise hard-swish: x * relu6(x + 3) / 6 (PyTorch h_swish semantics)."""
    if not jnp.issubdtype(x.dtype, jnp.floating):
        raise TypeError(f"h_swish expects a floating dtype, got {x.dtype}")
    total = x.size
    if total == 0:
        return x

    kw = dict(target_block_bytes=target_block_bytes,
              min_grid_blocks=min_grid_blocks,
              donate=donate)

    if x.ndim < 2:
        return _flat_path(x, **kw)

    # Collapse leading dims only (metadata-only: the minor one/two dims are kept
    # intact, so no relayout copy appears around the pallas_call).
    sub = _sublane_multiple(x.dtype)
    if x.ndim == 2:
        arr = x
    else:
        H, W = x.shape[-2], x.shape[-1]
        lead = total // (H * W)
        if H % sub == 0:
            arr = x.reshape(lead * H, W)   # fold the sublane dim too: finer-grained grid
        else:
            arr = x.reshape(lead, H, W)

    # If even a single leading-index slice cannot be double-buffered in VMEM,
    # fall back to flat lane-major tiling (may cost a relayout, but always fits).
    min_block = _padded_row_bytes(arr.shape, arr.dtype) * (sub if arr.ndim == 2 else 1)
    if min_block > _MAX_BLOCK_BYTES:
        return _flat_path(x, **kw)

    return _run_rows(arr, **kw).reshape(x.shape)


if __name__ == "__main__":
    key = jax.random.PRNGKey(0)
    k1, k2, k3 = jax.random.split(key, 3)

    def ref_fn(v):
        vf = v.astype(jnp.float32)
        return (vf * (jnp.clip(vf + 3.0, 0.0, 6.0) * (1.0 / 6.0))).astype(v.dtype)

    # 1) f32 NCHW, same convention as the PyTorch module (batch=2, ch=4, 16x16).
    #    Exercises the metadata-only leading+sublane fold -> (128, 16) row tiling.
    x = jax.random.normal(k1, (2, 4, 16, 16), dtype=jnp.float32) * 4.0
    y = jax.block_until_ready(h_swish(x))
    assert y.shape == x.shape and y.dtype == x.dtype
    assert jnp.allclose(y, ref_fn(x), atol=1e-5, rtol=1e-5), "f32 mismatch vs reference"

    # 2) bf16, awkward shape -> exercises the 3-D leading-dim-tiled path
    #    (no pad, no slice, no flat reshape).
    xb = (jax.random.normal(k2, (3, 5, 7, 11), dtype=jnp.float32) * 4.0
          ).astype(jnp.bfloat16)
    yb = jax.block_until_ready(h_swish(xb))
    assert yb.shape == xb.shape and yb.dtype == xb.dtype
    assert jnp.allclose(yb.astype(jnp.float32), ref_fn(xb).astype(jnp.float32),
                        atol=1e-2, rtol=1e-2), "bf16 mismatch vs reference"

    # 3) 1-D ragged length -> exercises the aligned-prefix + tiny-tail fallback.
    xv = jax.random.normal(k3, (1000,), dtype=jnp.float32) * 4.0
    yv = jax.block_until_ready(h_swish(xv))
    assert yv.shape == xv.shape and yv.dtype == xv.dtype
    assert jnp.allclose(yv, ref_fn(xv), atol=1e-5, rtol=1e-5), "1-D mismatch vs reference"

    print("KERNEL_OK")
</pallas_src>

<mosaic_0001>
module attributes {stable_mosaic.version = 11 : i64} {
  func.func @_h_swish_kernel(%arg0: i32, %arg1: memref<16x16xf32, #tpu.memory_space<vmem>>, %arg2: memref<16x16xf32, #tpu.memory_space<vmem>>) attributes {dimension_semantics = [#tpu.dimension_semantics<parallel>], iteration_bounds = array<i64: 8>, scalar_prefetch = 0 : i64, scratch_operands = 0 : i64, tpu.core_type = #tpu.core_type<tc>, window_params = [{transform_indices = @transform_0, window_bounds = array<i64: 16, 16>}, {transform_indices = @transform_1, window_bounds = array<i64: 16, 16>}]} {
    %c0 = arith.constant 0 : index
    %c0_0 = arith.constant 0 : index
    %0 = vector.load %arg1[%c0, %c0_0] : memref<16x16xf32, #tpu.memory_space<vmem>>, vector<16x16xf32>
    %cst = arith.constant 3.000000e+00 : f32
    %1 = vector.broadcast %cst : f32 to vector<16x16xf32>
    %2 = arith.addf %0, %1 : vector<16x16xf32>
    %cst_1 = arith.constant 0.000000e+00 : f32
    %cst_2 = arith.constant 6.000000e+00 : f32
    %3 = vector.broadcast %cst_1 : f32 to vector<16x16xf32>
    %4 = arith.maximumf %3, %2 : vector<16x16xf32>
    %5 = vector.broadcast %cst_2 : f32 to vector<16x16xf32>
    %6 = arith.minimumf %5, %4 : vector<16x16xf32>
    %cst_3 = arith.constant 0.166666672 : f32
    %7 = vector.broadcast %cst_3 : f32 to vector<16x16xf32>
    %8 = arith.mulf %6, %7 : vector<16x16xf32>
    %9 = arith.mulf %0, %8 : vector<16x16xf32>
    %c0_4 = arith.constant 0 : index
    %c0_5 = arith.constant 0 : index
    %10 = vector.load %arg2[%c0_4, %c0_5] : memref<16x16xf32, #tpu.memory_space<vmem>>, vector<16x16xf32>
    tpu.vector_store %arg2[%c0_4, %c0_5], %9 {strides = array<i32>} : memref<16x16xf32, #tpu.memory_space<vmem>>, vector<16x16xf32>,
    return
  }
  func.func @transform_0(%arg0: i32) -> (i32, i32) {
    %c0_i32 = arith.constant 0 : i32
    %c0_i32_0 = arith.constant 0 : i32
    return %arg0, %c0_i32 : i32, i32
  }
  func.func @transform_1(%arg0: i32) -> (i32, i32) {
    %c0_i32 = arith.constant 0 : i32
    %c0_i32_0 = arith.constant 0 : i32
    return %arg0, %c0_i32 : i32, i32
  }
}

</mosaic_0001>

<bundles_post_ra>
// kernel: tpu_custom_call.1
= control target key start
LH: loop header
LB: loop body
LE: loop exit
PB: predicated region body
PF: predicated region fallthrough
CT: control target
= control target key end

     0   :  { %s228_s6 = smov 0   ;;  %s245_s0 = inlined_call_operand.vmem [shape: f32[128,16], index: 0, kind: input, shape index: {}]   ;;  %s246_s1 = inlined_call_operand.vmem [shape: f32[128,16], index: 1, kind: output, shape index: {}]  }
   0x1 LB: > { %s191_s7 = sadd.s32 4294967295, %s216_s6   ;;  %p195_p0 = scmp.ge.s32.totalorder %s216_s6, 1  ;;  %s216_s6 = sphi %s228_s6, %s11_s6  }
   0x2   : > { %p88_p1 = scmp.lt.s32.totalorder %s216_s6, 9 }
   0x4   : > { %p89_p2 = pnand %p195_p0, %p88_p1 }
   0x5   : > { %s196_s8 = sshll.u32 (!%p89_p2), %s191_s7, 1  ;;  %vm132_vm0 = vcmask (!%p89_p2), 130048  }
   0x6   : > { %92 = sbr.rel (%p89_p2) target bundleno = 28 (0x1c), region = 24  ;;  %p109_p3 = scmp.lt.s32.totalorder (!%p89_p2), %s196_s8, 15 }
   0xd   : > { %s248_s8 = smov (!%p109_p3, %s196_s8), 15 }
   0xe   : > { %s197_s9 = sshll.u32 %s248_s8, 3 }
   0xf   : > { %s112_s12 = scalar_lea.vmem %s245_s0, %s197_s9  ;;  %s118_s15 = scalar_lea.vmem %s246_s1, %s197_s9 }
  0x10   : > { %v120_v0 = vld [vmem:[%s112_s12] sm:$0xff]  ;;  %v121_v1 = vld [vmem:[%s112_s12 + $0x8] sm:$0xff] }
  0x11   : > { %v122_v2 = vadd.f32 3.0, %v120_v0  ;;  %v123_v3 = vadd.f32 3.0, %v121_v1 }
  0x13   : > { %v124_v4 = vmax.f32 %v122_v2, 0.0  ;;  %v125_v5 = vmax.f32 %v123_v3, 0.0 }
  0x15   : > { %v126_v6 = vmin.f32 %v124_v4, 6.0  ;;  %v127_v7 = vmin.f32 %v125_v5, 6.0 }
  0x17   : > { %v128_v8 = vmul.f32 0.16666667, %v126_v6  ;;  %v129_v9 = vmul.f32 0.16666667, %v127_v7 }
  0x19   : > { %v130_v10 = vmul.f32 %v128_v8, %v120_v0  ;;  %v131_v11 = vmul.f32 %v129_v9, %v121_v1 }
  0x1b   : > { %133 = vst.msk [vmem:[%s118_s15] sm:$0xff] %vm132_vm0, %v130_v10  ;;  %134 = vst.msk [vmem:[%s118_s15 + $0x8] sm:$0xff] %vm132_vm0, %v131_v11 }
  0x1c PF: > { %s11_s6 = sadd.s32 1, %s216_s6  }
  0x1d   : > { %p8_p4 = scmp.ge.s32.totalorder %s11_s6, 10  }
  0x1f   :  { %10 = sbr.rel (!%p8_p4) target bundleno = 1 (0x1), region = 54 }

</bundles_post_ra>
